<compile_context>
chip_gen: v5e
topology: v5e:2x2
jax: 0.10.0
libtpu: 0.0.40
codegen_flags: <defaults>
</compile_context>

<pallas_src>
import functools

import jax
import jax.numpy as jnp
from jax import lax
from jax.experimental import pallas as pl
from jax.experimental.pallas import tpu as pltpu

BN_EPS = 1e-5


# --------------------------------------------------------------------------
# Kernel (feature-major: batch on the lane axis everywhere)
# --------------------------------------------------------------------------
def classifier_kernel(idx_ref, cont_ref, fembT_ref, w1cT_ref,
                      w2T_ref, b2T_ref, w3T_ref, b3T_ref, out_ref):
    idx = idx_ref[...]                              # (n_groups, Bt) int32, offset-adjusted
    total_cats = fembT_ref.shape[1]
    bt = idx.shape[1]

    # Multi-hot selector (total_cats, Bt): one "1" per categorical group per column.
    # fembT @ onehot == W1_emb^T @ concat(embeddings)^T  (gather done on the MXU).
    row_ids = lax.broadcasted_iota(jnp.int32, (total_cats, bt), 0)
    onehot = jnp.zeros((total_cats, bt), jnp.float32)
    for j in range(idx.shape[0]):                   # n_groups is small & static
        onehot = onehot + (row_ids == idx[j:j + 1, :]).astype(jnp.float32)

    # Linear1 (BN0 + b1 folded into fembT/w1cT) + ReLU.      -> (hidden, Bt)
    h1 = (jnp.dot(fembT_ref[...], onehot, preferred_element_type=jnp.float32)
          + jnp.dot(w1cT_ref[...], cont_ref[...], preferred_element_type=jnp.float32))
    h1 = jnp.maximum(h1, 0.0)

    # Linear2 (BN1 folded in) + ReLU.                        -> (half, Bt)
    h2 = jnp.dot(w2T_ref[...], h1, preferred_element_type=jnp.float32) + b2T_ref[...]
    h2 = jnp.maximum(h2, 0.0)

    # Output Linear (BN2 folded in), feature-major store.    -> (out_dim, Bt)
    out_ref[...] = (jnp.dot(w3T_ref[...], h2, preferred_element_type=jnp.float32)
                    + b3T_ref[...])


# --------------------------------------------------------------------------
# Offline parameter fusion (BN folding + embedding@W1 folding + b1 folding)
# Call ONCE; the forward path only consumes the fused dict.
# --------------------------------------------------------------------------
def fuse_params(params):
    # BN0 (on continuous inputs, before Linear1): fold into (w1_cont, b1).
    s0 = params["bn0_g"] * lax.rsqrt(params["bn0_v"] + BN_EPS)
    t0 = params["bn0_b"] - params["bn0_m"] * s0
    w1c = params["w1_cont"] * s0.reshape(-1, 1)
    b1 = params["b1"] + t0 @ params["w1_cont"]

    # BN1 (after ReLU of Linear1): fold into (w2, b2).
    s1 = params["bn1_g"] * lax.rsqrt(params["bn1_v"] + BN_EPS)
    t1 = params["bn1_b"] - params["bn1_m"] * s1
    w2 = params["w2"] * s1.reshape(-1, 1)
    b2 = params["b2"] + t1 @ params["w2"]

    # BN2 (after ReLU of Linear2): fold into (w3, b3).
    s2 = params["bn2_g"] * lax.rsqrt(params["bn2_v"] + BN_EPS)
    t2 = params["bn2_b"] - params["bn2_m"] * s2
    w3 = params["w3"] * s2.reshape(-1, 1)
    b3 = params["b3"] + t2 @ params["w3"]

    # Fold each embedding table through its W1 slice, stack, and absorb b1
    # (each sample selects exactly n_groups rows, so add b1/n_groups per row).
    femb_parts, offsets = [], []
    d_start, cat_off = 0, 0
    n_groups = len(params["emb_tables"])
    for tbl in params["emb_tables"]:
        cat, dim = tbl.shape
        femb_parts.append(tbl @ params["w1_emb"][d_start:d_start + dim])
        offsets.append(cat_off)
        d_start += dim
        cat_off += cat
    femb = jnp.concatenate(femb_parts, axis=0) + b1 / n_groups  # (total_cats, hidden)
    offsets = jnp.asarray(offsets, jnp.int32).reshape(-1, 1)    # (n_groups, 1)

    # Feature-major (transposed) weights for the kernel.
    return dict(
        fembT=jnp.asarray(femb.T, jnp.float32),     # (hidden, total_cats)
        w1cT=jnp.asarray(w1c.T, jnp.float32),       # (hidden, cont_dim)
        w2T=jnp.asarray(w2.T, jnp.float32),         # (half, hidden)
        b2T=jnp.asarray(b2.T, jnp.float32),         # (half, 1)
        w3T=jnp.asarray(w3.T, jnp.float32),         # (out_dim, half)
        b3T=jnp.asarray(b3.T, jnp.float32),         # (out_dim, 1)
        offsets=offsets,
    )


# --------------------------------------------------------------------------
# Forward wrapper (consumes the fused params; feature-major I/O)
# --------------------------------------------------------------------------
@functools.partial(jax.jit, static_argnames=("batch_tile",))
def classifier_forward(fused, x_cont, x_cat, *, batch_tile=512):
    """Forward pass. x_cont: (B, cont_dims) f32; x_cat: (B, n_emb_layers) i32."""
    B = x_cont.shape[0]
    hidden, total_cats = fused["fembT"].shape
    cont_dim = fused["w1cT"].shape[1]
    half = fused["w2T"].shape[0]
    out_dim = fused["w3T"].shape[0]
    n_groups = x_cat.shape[1]

    # Feature-major inputs: (n_groups, B) and (cont_dim, B); indices offset
    # into the stacked folded-embedding table.
    idx = x_cat.astype(jnp.int32).T + fused["offsets"]
    cont = x_cont.astype(jnp.float32).T

    # Pad batch (lane axis) to a multiple of the tile; padded columns discarded.
    # NOTE: for v7x keep grid_b >= 2 at realistic B so both TensorCores work.
    grid_b = pl.cdiv(B, batch_tile)
    b_pad = grid_b * batch_tile
    if b_pad != B:
        idx = jnp.pad(idx, ((0, 0), (0, b_pad - B)))
        cont = jnp.pad(cont, ((0, 0), (0, b_pad - B)))

    def col_spec(rows):                       # batch-tiled (feature-major) activations
        return pl.BlockSpec((rows, batch_tile), lambda i: (0, i))

    def const_spec(shape):                    # VMEM-resident weights
        return pl.BlockSpec(shape, lambda i: (0, 0))

    out = pl.pallas_call(
        classifier_kernel,
        out_shape=jax.ShapeDtypeStruct((out_dim, b_pad), jnp.float32),
        grid=(grid_b,),
        in_specs=[
            col_spec(n_groups),                    # idx            (n_groups, Bt)
            col_spec(cont_dim),                    # x_cont^T       (cont_dim, Bt)
            const_spec((hidden, total_cats)),      # folded emb @ W1, transposed
            const_spec((hidden, cont_dim)),        # W1_cont^T (BN0 folded)
            const_spec((half, hidden)),            # W2^T (BN1 folded)
            const_spec((half, 1)),                 # b2^T
            const_spec((out_dim, half)),           # W3^T (BN2 folded)
            const_spec((out_dim, 1)),              # b3^T
        ],
        out_specs=col_spec(out_dim),
        compiler_params=pltpu.CompilerParams(dimension_semantics=("parallel",)),
    )(idx, cont, fused["fembT"], fused["w1cT"], fused["w2T"], fused["b2T"],
      fused["w3T"], fused["b3T"])

    return out[:, :B].T                            # (B, out_dim)


# --------------------------------------------------------------------------
# Parameter init (PyTorch-equivalent: kaiming weights, default BN stats)
# --------------------------------------------------------------------------
def kaiming_normal(key, shape, fan_in):
    std = (2.0 / fan_in) ** 0.5
    return std * jax.random.normal(key, shape, dtype=jnp.float32)


def init_params(key, hidden, output_size, continuous_size, embedding_sizes):
    keys = jax.random.split(key, 8 + len(embedding_sizes))
    n_emb = sum(size for _, size in embedding_sizes)
    in_features = n_emb + continuous_size
    half = int(hidden / 2)

    emb_tables = [
        kaiming_normal(keys[i], (cat, size), fan_in=size)
        for i, (cat, size) in enumerate(embedding_sizes)
    ]
    k = len(embedding_sizes)

    def bn_params(c):
        return (jnp.ones((1, c), jnp.float32), jnp.zeros((1, c), jnp.float32),
                jnp.zeros((1, c), jnp.float32), jnp.ones((1, c), jnp.float32))

    bn0_g, bn0_b, bn0_m, bn0_v = bn_params(continuous_size)
    bn1_g, bn1_b, bn1_m, bn1_v = bn_params(hidden)
    bn2_g, bn2_b, bn2_m, bn2_v = bn_params(half)

    w1 = kaiming_normal(keys[k + 0], (in_features, hidden), fan_in=in_features)
    w2 = kaiming_normal(keys[k + 1], (hidden, half), fan_in=hidden)
    w3 = kaiming_normal(keys[k + 2], (half, output_size), fan_in=half)

    return {
        "emb_tables": emb_tables,
        "bn0_g": bn0_g, "bn0_b": bn0_b, "bn0_m": bn0_m, "bn0_v": bn0_v,
        "w1_emb": w1[:n_emb], "w1_cont": w1[n_emb:],
        "b1": jnp.zeros((1, hidden), jnp.float32),
        "bn1_g": bn1_g, "bn1_b": bn1_b, "bn1_m": bn1_m, "bn1_v": bn1_v,
        "w2": w2, "b2": jnp.zeros((1, half), jnp.float32),
        "bn2_g": bn2_g, "bn2_b": bn2_b, "bn2_m": bn2_m, "bn2_v": bn2_v,
        "w3": w3, "b3": jnp.zeros((1, output_size), jnp.float32),
    }


def reference_forward(params, x_cont, x_cat):
    """Pure-JAX reference (unfused, same eval-mode semantics)."""
    emb = jnp.concatenate(
        [jnp.take(t, x_cat[:, i], axis=0) for i, t in enumerate(params["emb_tables"])],
        axis=1)
    cont = (x_cont - params["bn0_m"]) / jnp.sqrt(params["bn0_v"] + BN_EPS)
    cont = cont * params["bn0_g"] + params["bn0_b"]
    x = jnp.concatenate([emb, cont], axis=1)
    w1 = jnp.concatenate([params["w1_emb"], params["w1_cont"]], axis=0)
    h = jnp.maximum(x @ w1 + params["b1"], 0.0)
    h = (h - params["bn1_m"]) / jnp.sqrt(params["bn1_v"] + BN_EPS) * params["bn1_g"] + params["bn1_b"]
    h = jnp.maximum(h @ params["w2"] + params["b2"], 0.0)
    h = (h - params["bn2_m"]) / jnp.sqrt(params["bn2_v"] + BN_EPS) * params["bn2_g"] + params["bn2_b"]
    return h @ params["w3"] + params["b3"]


if __name__ == "__main__":
    key = jax.random.PRNGKey(0)

    hidden = 32
    output_size = 2
    continuous_size = 4
    embedding_sizes = [(10, 5), (7, 3), (4, 2)]   # (num_categories, emb_dim)
    batch = 8

    kp, kc, kcat = jax.random.split(key, 3)
    params = init_params(kp, hidden, output_size, continuous_size, embedding_sizes)

    x_cont = jax.random.normal(kc, (batch, continuous_size), dtype=jnp.float32)
    cat_keys = jax.random.split(kcat, len(embedding_sizes))
    x_cat = jnp.stack(
        [jax.random.randint(cat_keys[i], (batch,), 0, embedding_sizes[i][0])
         for i in range(len(embedding_sizes))],
        axis=1).astype(jnp.int32)

    # Fuse parameters ONCE (hoisted out of the forward path).
    fused = jax.tree_util.tree_map(jax.block_until_ready, fuse_params(params))

    out = classifier_forward(fused, x_cont, x_cat)
    out = jax.block_until_ready(out)

    ref = reference_forward(params, x_cont, x_cat)
    assert out.shape == (batch, output_size), out.shape
    assert jnp.allclose(out, ref, atol=1e-4, rtol=1e-4), "mismatch vs JAX reference"

    # TODO(synk): dropout/BatchNorm implemented in eval mode (identity dropout,
    # running-stat BN); training-mode batch statistics are not reproduced.
    print("KERNEL_OK")
</pallas_src>

<mosaic_0001>
module attributes {stable_mosaic.version = 11 : i64} {
  func.func @classifier_kernel(%arg0: i32, %arg1: memref<3x512xi32, #tpu.memory_space<vmem>>, %arg2: memref<4x512xf32, #tpu.memory_space<vmem>>, %arg3: memref<32x21xf32, #tpu.memory_space<vmem>>, %arg4: memref<32x4xf32, #tpu.memory_space<vmem>>, %arg5: memref<16x32xf32, #tpu.memory_space<vmem>>, %arg6: memref<16x1xf32, #tpu.memory_space<vmem>>, %arg7: memref<2x16xf32, #tpu.memory_space<vmem>>, %arg8: memref<2x1xf32, #tpu.memory_space<vmem>>, %arg9: memref<2x512xf32, #tpu.memory_space<vmem>>) attributes {dimension_semantics = [#tpu.dimension_semantics<parallel>], iteration_bounds = array<i64: 1>, scalar_prefetch = 0 : i64, scratch_operands = 0 : i64, tpu.core_type = #tpu.core_type<tc>, window_params = [{transform_indices = @transform_0, window_bounds = array<i64: 3, 512>}, {transform_indices = @transform_1, window_bounds = array<i64: 4, 512>}, {pipeline_mode = #tpu.pipeline_mode<synchronous>, transform_indices = @transform_2, window_bounds = array<i64: 32, 21>}, {pipeline_mode = #tpu.pipeline_mode<synchronous>, transform_indices = @transform_3, window_bounds = array<i64: 32, 4>}, {pipeline_mode = #tpu.pipeline_mode<synchronous>, transform_indices = @transform_4, window_bounds = array<i64: 16, 32>}, {pipeline_mode = #tpu.pipeline_mode<synchronous>, transform_indices = @transform_5, window_bounds = array<i64: 16, 1>}, {pipeline_mode = #tpu.pipeline_mode<synchronous>, transform_indices = @transform_6, window_bounds = array<i64: 2, 16>}, {pipeline_mode = #tpu.pipeline_mode<synchronous>, transform_indices = @transform_7, window_bounds = array<i64: 2, 1>}, {transform_indices = @transform_8, window_bounds = array<i64: 2, 512>}]} {
    %c0 = arith.constant 0 : index
    %c0_0 = arith.constant 0 : index
    %0 = vector.load %arg1[%c0, %c0_0] : memref<3x512xi32, #tpu.memory_space<vmem>>, vector<3x512xi32>
    %1 = tpu.iota {dimensions = array<i32: 0>} : vector<21x512xi32>
    %cst = arith.constant 0.000000e+00 : f32
    %2 = vector.broadcast %cst : f32 to vector<21x512xf32>
    %3 = vector.extract_strided_slice %0 {offsets = [0, 0], sizes = [1, 512], strides = [1, 1]} : vector<3x512xi32> to vector<1x512xi32>
    %4 = vector.broadcast %3 : vector<1x512xi32> to vector<21x512xi32>
    %5 = arith.cmpi eq, %1, %4 : vector<21x512xi32>
    %6 = arith.extui %5 : vector<21x512xi1> to vector<21x512xi32>
    %7 = arith.sitofp %6 : vector<21x512xi32> to vector<21x512xf32>
    %8 = arith.addf %2, %7 : vector<21x512xf32>
    %9 = vector.extract_strided_slice %0 {offsets = [1, 0], sizes = [1, 512], strides = [1, 1]} : vector<3x512xi32> to vector<1x512xi32>
    %10 = vector.broadcast %9 : vector<1x512xi32> to vector<21x512xi32>
    %11 = arith.cmpi eq, %1, %10 : vector<21x512xi32>
    %12 = arith.extui %11 : vector<21x512xi1> to vector<21x512xi32>
    %13 = arith.sitofp %12 : vector<21x512xi32> to vector<21x512xf32>
    %14 = arith.addf %8, %13 : vector<21x512xf32>
    %15 = vector.extract_strided_slice %0 {offsets = [2, 0], sizes = [1, 512], strides = [1, 1]} : vector<3x512xi32> to vector<1x512xi32>
    %16 = vector.broadcast %15 : vector<1x512xi32> to vector<21x512xi32>
    %17 = arith.cmpi eq, %1, %16 : vector<21x512xi32>
    %18 = arith.extui %17 : vector<21x512xi1> to vector<21x512xi32>
    %19 = arith.sitofp %18 : vector<21x512xi32> to vector<21x512xf32>
    %20 = arith.addf %14, %19 : vector<21x512xf32>
    %c0_1 = arith.constant 0 : index
    %c0_2 = arith.constant 0 : index
    %21 = vector.load %arg3[%c0_1, %c0_2] : memref<32x21xf32, #tpu.memory_space<vmem>>, vector<32x21xf32>
    %cst_3 = arith.constant dense<0.000000e+00> : vector<32x512xf32>
    %22 = tpu.matmul %21, %20, %cst_3 {dimension_numbers = #tpu.dot_dimension_numbers<[1], [0], [0], [1], [0, 0, 1, 1], [], []>} : vector<32x21xf32>, vector<21x512xf32>, vector<32x512xf32> -> vector<32x512xf32>
    %c0_4 = arith.constant 0 : index
    %c0_5 = arith.constant 0 : index
    %23 = vector.load %arg4[%c0_4, %c0_5] : memref<32x4xf32, #tpu.memory_space<vmem>>, vector<32x4xf32>
    %c0_6 = arith.constant 0 : index
    %c0_7 = arith.constant 0 : index
    %24 = vector.load %arg2[%c0_6, %c0_7] : memref<4x512xf32, #tpu.memory_space<vmem>>, vector<4x512xf32>
    %cst_8 = arith.constant dense<0.000000e+00> : vector<32x512xf32>
    %25 = tpu.matmul %23, %24, %cst_8 {dimension_numbers = #tpu.dot_dimension_numbers<[1], [0], [0], [1], [0, 0, 1, 1], [], []>} : vector<32x4xf32>, vector<4x512xf32>, vector<32x512xf32> -> vector<32x512xf32>
    %26 = arith.addf %22, %25 : vector<32x512xf32>
    %cst_9 = arith.constant 0.000000e+00 : f32
    %27 = vector.broadcast %cst_9 : f32 to vector<32x512xf32>
    %28 = arith.maximumf %26, %27 : vector<32x512xf32>
    %c0_10 = arith.constant 0 : index
    %c0_11 = arith.constant 0 : index
    %29 = vector.load %arg5[%c0_10, %c0_11] : memref<16x32xf32, #tpu.memory_space<vmem>>, vector<16x32xf32>
    %cst_12 = arith.constant dense<0.000000e+00> : vector<16x512xf32>
    %30 = tpu.matmul %29, %28, %cst_12 {dimension_numbers = #tpu.dot_dimension_numbers<[1], [0], [0], [1], [0, 0, 1, 1], [], []>} : vector<16x32xf32>, vector<32x512xf32>, vector<16x512xf32> -> vector<16x512xf32>
    %c0_13 = arith.constant 0 : index
    %c0_14 = arith.constant 0 : index
    %31 = vector.load %arg6[%c0_13, %c0_14] : memref<16x1xf32, #tpu.memory_space<vmem>>, vector<16x1xf32>
    %32 = vector.broadcast %31 : vector<16x1xf32> to vector<16x512xf32>
    %33 = arith.addf %30, %32 : vector<16x512xf32>
    %cst_15 = arith.constant 0.000000e+00 : f32
    %34 = vector.broadcast %cst_15 : f32 to vector<16x512xf32>
    %35 = arith.maximumf %33, %34 : vector<16x512xf32>
    %c0_16 = arith.constant 0 : index
    %c0_17 = arith.constant 0 : index
    %36 = vector.load %arg7[%c0_16, %c0_17] : memref<2x16xf32, #tpu.memory_space<vmem>>, vector<2x16xf32>
    %cst_18 = arith.constant dense<0.000000e+00> : vector<2x512xf32>
    %37 = tpu.matmul %36, %35, %cst_18 {dimension_numbers = #tpu.dot_dimension_numbers<[1], [0], [0], [1], [0, 0, 1, 1], [], []>} : vector<2x16xf32>, vector<16x512xf32>, vector<2x512xf32> -> vector<2x512xf32>
    %c0_19 = arith.constant 0 : index
    %c0_20 = arith.constant 0 : index
    %38 = vector.load %arg8[%c0_19, %c0_20] : memref<2x1xf32, #tpu.memory_space<vmem>>, vector<2x1xf32>
    %39 = vector.broadcast %38 : vector<2x1xf32> to vector<2x512xf32>
    %40 = arith.addf %37, %39 : vector<2x512xf32>
    %c0_21 = arith.constant 0 : index
    %c0_22 = arith.constant 0 : index
    %41 = vector.load %arg9[%c0_21, %c0_22] : memref<2x512xf32, #tpu.memory_space<vmem>>, vector<2x512xf32>
    tpu.vector_store %arg9[%c0_21, %c0_22], %40 {strides = array<i32>} : memref<2x512xf32, #tpu.memory_space<vmem>>, vector<2x512xf32>,
    return
  }
  func.func @transform_0(%arg0: i32) -> (i32, i32) {
    %c0_i32 = arith.constant 0 : i32
    %c0_i32_0 = arith.constant 0 : i32
    return %c0_i32, %arg0 : i32, i32
  }
  func.func @transform_1(%arg0: i32) -> (i32, i32) {
    %c0_i32 = arith.constant 0 : i32
    %c0_i32_0 = arith.constant 0 : i32
    return %c0_i32, %arg0 : i32, i32
  }
  func.func @transform_2(%arg0: i32) -> (i32, i32) {
    %c0_i32 = arith.constant 0 : i32
    %c0_i32_0 = arith.constant 0 : i32
    %c0_i32_1 = arith.constant 0 : i32
    return %c0_i32, %c0_i32_0 : i32, i32
  }
  func.func @transform_3(%arg0: i32) -> (i32, i32) {
    %c0_i32 = arith.constant 0 : i32
    %c0_i32_0 = arith.constant 0 : i32
    %c0_i32_1 = arith.constant 0 : i32
    return %c0_i32, %c0_i32_0 : i32, i32
  }
  func.func @transform_4(%arg0: i32) -> (i32, i32) {
    %c0_i32 = arith.constant 0 : i32
    %c0_i32_0 = arith.constant 0 : i32
    %c0_i32_1 = arith.constant 0 : i32
    return %c0_i32, %c0_i32_0 : i32, i32
  }
  func.func @transform_5(%arg0: i32) -> (i32, i32) {
    %c0_i32 = arith.constant 0 : i32
    %c0_i32_0 = arith.constant 0 : i32
    %c0_i32_1 = arith.constant 0 : i32
    return %c0_i32, %c0_i32_0 : i32, i32
  }
  func.func @transform_6(%arg0: i32) -> (i32, i32) {
    %c0_i32 = arith.constant 0 : i32
    %c0_i32_0 = arith.constant 0 : i32
    %c0_i32_1 = arith.constant 0 : i32
    return %c0_i32, %c0_i32_0 : i32, i32
  }
  func.func @transform_7(%arg0: i32) -> (i32, i32) {
    %c0_i32 = arith.constant 0 : i32
    %c0_i32_0 = arith.constant 0 : i32
    %c0_i32_1 = arith.constant 0 : i32
    return %c0_i32, %c0_i32_0 : i32, i32
  }
  func.func @transform_8(%arg0: i32) -> (i32, i32) {
    %c0_i32 = arith.constant 0 : i32
    %c0_i32_0 = arith.constant 0 : i32
    return %c0_i32, %arg0 : i32, i32
  }
}

</mosaic_0001>

<bundles_post_ra>
// kernel: classifier_forward.1
= control target key start
LH: loop header
LB: loop body
LE: loop exit
PB: predicated region body
PF: predicated region fallthrough
CT: control target
= control target key end

     0   :  { %v31_v0 = vlaneseq  ;;  %vm235_vm0 = vcmask 1043456   ;;  %vm222_vm1 = vcmask 31744   ;;  %vm373_vm2 = vcmask 1044480   ;;  %s1167_s1 = inlined_call_operand.vmem [shape: f32[4,512], index: 1, kind: input, shape index: {}]   ;;  %s1168_s0 = inlined_call_operand.vmem [shape: s32[3,512], index: 0, kind: input, shape index: {}]   ;;  %s1169_s3 = inlined_call_operand.vmem [shape: f32[32,4], index: 3, kind: input, shape index: {}]   ;;  %s1170_s2 = inlined_call_operand.vmem [shape: f32[32,21], index: 2, kind: input, shape index: {}]   ;;  %s1171_s5 = inlined_call_operand.vmem [shape: f32[16,1], index: 5, kind: input, shape index: {}]   ;;  %s1172_s4 = inlined_call_operand.vmem [shape: f32[16,32], index: 4, kind: input, shape index: {}]   ;;  %s1173_s7 = inlined_call_operand.vmem [shape: f32[2,1], index: 7, kind: input, shape index: {}]   ;;  %s1174_s6 = inlined_call_operand.vmem [shape: f32[2,16], index: 6, kind: input, shape index: {}]   ;;  %s1175_s8 = inlined_call_operand.vmem [shape: f32[2,512], index: 8, kind: output, shape index: {}]  }
   0x1   :  { %v211_v1 = vld [vmem:[%s1167_s1] sm:$0xff]  ;;  %v212_v2 = vld [vmem:[%s1167_s1 + $0x8] sm:$0xff]  ;;  %v840_v27 = vmov 0.0  }
   0x2   :  { %215 = vst [vmem:[#allocation1] ss:$2 sm:$0xff] %v211_v1  ;;  %v893_v3 = vshrl.u32 %v31_v0, 7  ;;  %v30_v4 = vld [vmem:[%s1168_s0 + $0x8] sm:$0x77]  ;;  %v207_v21 = vld [vmem:[%s1169_s3] sm:$0xff] }
   0x3   :  { %217 = vst [vmem:[#allocation1 + $0x10] ss:$2 sm:$0xff] %v212_v2  ;;  %v37_v6 = vperm.slane %v30_v4, 0  ;;  %v93_v7 = vperm.slane %v30_v4, 1  ;;  %v149_v8 = vperm.slane %v30_v4, 2  ;;  %v38_v10 = vperm.slane %v30_v4, 4 }
   0x4   :  { %v899_v5 = vadd.s32 16, %v893_v3  ;;  %v29_v9 = vld [vmem:[%s1168_s0] sm:$0x77]  ;;  %v94_v11 = vperm.slane %v30_v4, 5  ;;  %v150_v12 = vperm.slane %v30_v4, 6  ;;  %v968_v43 = vadd.s32 8, %v893_v3 }
   0x5   :  { %v904_v13 = vperm.slane %v37_v6, 0  ;;  %v906_v14 = vperm.slane %v93_v7, 1  ;;  %v908_v15 = vperm.slane %v149_v8, 2  ;;  %v35_v16 = vperm.slane %v29_v9, 0  ;;  %v208_v50 = vld [vmem:[%s1169_s3 + $0x8] sm:$0xff]  ;;  %v209_v6 = vld [vmem:[%s1169_s3 + $0x10] sm:$0xff] }
   0x6   :  { %v910_v17 = vperm.slane %v38_v10, 0  ;;  %v912_v18 = vperm.slane %v94_v11, 1  ;;  %v914_v19 = vperm.slane %v150_v12, 2  ;;  %v91_v20 = vperm.slane %v29_v9, 1 }
   0x7   :  { %vm53_vm3 = vcmp.eq.s32.totalorder %v899_v5, %v904_v13  ;;  %vm109_vm4 = vcmp.eq.s32.totalorder %v899_v5, %v906_v14  ;;  %vm165_vm5 = vcmp.eq.s32.totalorder %v899_v5, %v908_v15  ;;  %v925_v22 = vperm.slane %v35_v16, 0 }
   0x8   :  { %vm54_vm6 = vcmp.eq.s32.totalorder %v899_v5, %v910_v17  ;;  %vm110_vm7 = vcmp.eq.s32.totalorder %v899_v5, %v912_v18  ;;  %vm166_vm8 = vcmp.eq.s32.totalorder %v899_v5, %v914_v19  ;;  %v758_v28 = vsel %vm53_vm3, 1.0, %v840_v27 }
   0x9   :  { %v218_v23 = vld.sshfl [vmem:[#allocation1] sm:$0xff pattern:$0x75316420]  ;;  %v219_v24 = vld.sshfl [vmem:[#allocation1 + $0x8] sm:$0xff pattern:$0x75316420]  ;;  %vm51_vm9 = vcmp.eq.s32.totalorder %v899_v5, %v925_v22  ;;  %vm43_vm11 = vcmp.eq.s32.totalorder %v893_v3, %v925_v22  ;;  %vm47_vm12 = vcmp.eq.s32.totalorder %v968_v43, %v925_v22 }
   0xa   :  { %784 = vmatpush.msk.msra.mxu0 %vm235_vm0, %v218_v23  ;;  %789 = vmatpush.msk.msra.mxu1 %vm235_vm0, %v219_v24  ;;  %v220_v25 = vld.sshfl [vmem:[#allocation1 + $0x10] sm:$0xff pattern:$0x75316420]  ;;  %v221_v26 = vld.sshfl [vmem:[#allocation1 + $0x18] sm:$0xff pattern:$0x75316420] }
   0xb   :  { %794 = vmatpush.msk.msra.mxu2 %vm235_vm0, %v220_v25  ;;  %799 = vmatpush.msk.msra.mxu3 %vm235_vm0, %v221_v26  ;;  %v770_v29 = vsel %vm109_vm4, 1.0, %v840_v27  ;;  %v782_v30 = vsel %vm165_vm5, 1.0, %v840_v27  ;;  %v759_v31 = vsel %vm54_vm6, 1.0, %v840_v27  ;;  %v771_v33 = vsel %vm110_vm7, 1.0, %v840_v27 }
   0xc   :  { %785 = vmatmul.msk.f32.vlgmr.msra.gmra.mxu0 %vm222_vm1, %v207_v21  ;;  %790 = vmatmul.msk.f32.vlgmr.msra.gmra.mxu1 %vm222_vm1, %v207_v21  ;;  %v145_v32 = vadd.f32 %v770_v29, %v758_v28  ;;  %v783_v34 = vsel %vm166_vm8, 1.0, %v840_v27  ;;  %v756_v35 = vsel %vm51_vm9, 1.0, %v840_v27  ;;  %v146_v36 = vadd.f32 %v771_v33, %v759_v31 }
   0xd   :  { %795 = vmatmul.msk.f32.vlgmr.msra.gmra.mxu2 %vm222_vm1, %v207_v21  ;;  %800 = vmatmul.msk.f32.vlgmr.msra.gmra.mxu3 %vm222_vm1, %v207_v21  ;;  %v965_v37 = vperm.slane %v91_v20, 1  ;;  %v147_v38 = vperm.slane %v29_v9, 2  ;;  %v36_v39 = vperm.slane %v29_v9, 4  ;;  %v92_v41 = vperm.slane %v29_v9, 5 }
   0xe   :  { %v201_v40 = vadd.f32 %v782_v30, %v145_v32  ;;  %v148_v42 = vperm.slane %v29_v9, 6  ;;  %v202_v44 = vadd.f32 %v783_v34, %v146_v36  ;;  %v752_v52 = vsel %vm47_vm12, 1.0, %v840_v27 }
   0xf   :  { %vm107_vm10 = vcmp.eq.s32.totalorder %v899_v5, %v965_v37  ;;  %v972_v45 = vperm.slane %v147_v38, 2  ;;  %v974_v46 = vperm.slane %v36_v39, 0  ;;  %v980_v48 = vperm.slane %v92_v41, 1 }
  0x10   :  { %814 = vmatpush.msk.msrb.mxu2 %vm373_vm2, %v201_v40  ;;  %v768_v47 = vsel %vm107_vm10, 1.0, %v840_v27  ;;  %v982_v49 = vperm.slane %v148_v42, 2  ;;  %819 = vmatpush.msk.msrb.mxu3 %vm373_vm2, %v202_v44  ;;  %vm103_vm4 = vcmp.eq.s32.totalorder %v968_v43, %v965_v37  ;;  %vm45_vm5 = vcmp.eq.s32.totalorder %v893_v3, %v904_v13  ;;  %v206_v40 = vld [vmem:[%s1170_s2 + $0x18] sm:$0xff] }
  0x11   :  { %v143_v51 = vadd.f32 %v768_v47, %v756_v35  ;;  %vm163_vm13 = vcmp.eq.s32.totalorder %v899_v5, %v972_v45  ;;  %vm52_vm14 = vcmp.eq.s32.totalorder %v899_v5, %v974_v46  ;;  %vm108_vm15 = vcmp.eq.s32.totalorder %v899_v5, %v980_v48 }
  0x12   :  { %v780_v53 = vsel %vm163_vm13, 1.0, %v840_v27  ;;  %v757_v54 = vsel %vm52_vm14, 1.0, %v840_v27  ;;  %vm164_vm3 = vcmp.eq.s32.totalorder %v899_v5, %v982_v49  ;;  %v769_v56 = vsel %vm108_vm15, 1.0, %v840_v27 }
  0x13   :  { %v199_v55 = vadd.f32 %v780_v53, %v143_v51  ;;  %v781_v57 = vsel %vm164_vm3, 1.0, %v840_v27  ;;  %vm101_vm6 = vcmp.eq.s32.totalorder %v893_v3, %v906_v14  ;;  %v144_v58 = vadd.f32 %v769_v56, %v757_v54 }
  0x14   :  { %786 = vmatmul.msk.f32.gmra.mxu0 %vm222_vm1, %v208_v50  ;;  %791 = vmatmul.msk.f32.gmra.mxu1 %vm222_vm1, %v208_v50  ;;  %v764_v59 = vsel %vm103_vm4, 1.0, %v840_v27  ;;  %vm159_vm7 = vcmp.eq.s32.totalorder %v968_v43, %v972_v45  ;;  %vm48_vm8 = vcmp.eq.s32.totalorder %v968_v43, %v974_v46  ;;  %vm104_vm9 = vcmp.eq.s32.totalorder %v968_v43, %v980_v48 }
  0x15   :  { %796 = vmatmul.msk.f32.gmra.mxu2 %vm222_vm1, %v208_v50  ;;  %801 = vmatmul.msk.f32.gmra.mxu3 %vm222_vm1, %v208_v50  ;;  %v139_v60 = vadd.f32 %v764_v59, %v752_v52  ;;  %v776_v61 = vsel %vm159_vm7, 1.0, %v840_v27  ;;  %v753_v62 = vsel %vm48_vm8, 1.0, %v840_v27  ;;  %v200_v63 = vadd.f32 %v781_v57, %v144_v58 }
  0x16   :  { %804 = vmatpush.msk.msrb.mxu0 %vm373_vm2, %v199_v55  ;;  %v765_v0 = vsel %vm104_vm9, 1.0, %v840_v27  ;;  %vm160_vm10 = vcmp.eq.s32.totalorder %v968_v43, %v982_v49  ;;  %vm49_vm12 = vcmp.eq.s32.totalorder %v968_v43, %v904_v13  ;;  %vm105_vm13 = vcmp.eq.s32.totalorder %v968_v43, %v906_v14  ;;  %v210_v13 = vld [vmem:[%s1169_s3 + $0x18] sm:$0xff] }
  0x17   :  { %v195_v1 = vadd.f32 %v776_v61, %v139_v60  ;;  %v140_v2 = vadd.f32 %v765_v0, %v753_v62  ;;  %v777_v4 = vsel %vm160_vm10, 1.0, %v840_v27  ;;  %v754_v5 = vsel %vm49_vm12, 1.0, %v840_v27  ;;  %809 = vmatpush.msk.msrb.mxu1 %vm373_vm2, %v200_v63 }
  0x18   :  { %vm161_vm14 = vcmp.eq.s32.totalorder %v968_v43, %v908_v15  ;;  %vm50_vm15 = vcmp.eq.s32.totalorder %v968_v43, %v910_v17  ;;  %vm106_vm3 = vcmp.eq.s32.totalorder %v968_v43, %v912_v18  ;;  %v766_v8 = vsel %vm105_vm13, 1.0, %v840_v27 }
  0x19   :  { %400 = vmatpush.msrb.mxu0 %v195_v1  ;;  %v196_v7 = vadd.f32 %v777_v4, %v140_v2  ;;  %v778_v9 = vsel %vm161_vm14, 1.0, %v840_v27  ;;  %v755_v10 = vsel %vm50_vm15, 1.0, %v840_v27  ;;  %v141_v11 = vadd.f32 %v766_v8, %v754_v5  ;;  %v521_v5 = vld [vmem:[%s1171_s5 + $0x8] sm:$0xff] }
  0x1a   :  { %v767_v12 = vsel %vm106_vm3, 1.0, %v840_v27  ;;  %vm162_vm2 = vcmp.eq.s32.totalorder %v968_v43, %v914_v19  ;;  %v748_v16 = vsel %vm43_vm11, 1.0, %v840_v27  ;;  %vm99_vm4 = vcmp.eq.s32.totalorder %v893_v3, %v965_v37 }
  0x1b   :  { %429 = vmatpush.msrb.mxu1 %v196_v7  ;;  %v142_v20 = vadd.f32 %v767_v12, %v755_v10  ;;  %v779_v21 = vsel %vm162_vm2, 1.0, %v840_v27  ;;  %vm155_vm7 = vcmp.eq.s32.totalorder %v893_v3, %v972_v45  ;;  %v197_v23 = vadd.f32 %v778_v9, %v141_v11 }
  0x1c   :  { %787 = vmatmul.msk.f32.gmra.mxu0 %vm222_vm1, %v209_v6  ;;  %792 = vmatmul.msk.f32.gmra.mxu1 %vm222_vm1, %v209_v6  ;;  %v760_v24 = vsel %vm99_vm4, 1.0, %v840_v27  ;;  %v772_v22 = vsel %vm155_vm7, 1.0, %v840_v27  ;;  %vm44_vm11 = vcmp.eq.s32.totalorder %v893_v3, %v974_v46  ;;  %vm100_vm8 = vcmp.eq.s32.totalorder %v893_v3, %v980_v48 }
  0x1d   :  { %797 = vmatmul.msk.f32.gmra.mxu2 %vm222_vm1, %v209_v6  ;;  %802 = vmatmul.msk.f32.gmra.mxu3 %vm222_vm1, %v209_v6  ;;  %v198_v25 = vadd.f32 %v779_v21, %v142_v20  ;;  %v135_v26 = vadd.f32 %v760_v24, %v748_v16  ;;  %v749_v28 = vsel %vm44_vm11, 1.0, %v840_v27  ;;  %v761_v29 = vsel %vm100_vm8, 1.0, %v840_v27  ;;  %v520_v20 = vld [vmem:[%s1171_s5] sm:$0xff] }
  0x1e   :  { %458 = vmatpush.msrb.mxu2 %v197_v23  ;;  %vm156_vm9 = vcmp.eq.s32.totalorder %v893_v3, %v982_v49  ;;  %v750_v30 = vsel %vm45_vm5, 1.0, %v840_v27  ;;  %v762_v31 = vsel %vm101_vm6, 1.0, %v840_v27  ;;  %v136_v33 = vadd.f32 %v761_v29, %v749_v28 }
  0x1f   :  { %487 = vmatpush.msrb.mxu3 %v198_v25  ;;  %v191_v32 = vadd.f32 %v772_v22, %v135_v26  ;;  %v773_v34 = vsel %vm156_vm9, 1.0, %v840_v27  ;;  %v137_v35 = vadd.f32 %v762_v31, %v750_v30  ;;  %vm157_vm10 = vcmp.eq.s32.totalorder %v893_v3, %v908_v15 }
  0x20   :  { %vm46_vm12 = vcmp.eq.s32.totalorder %v893_v3, %v910_v17  ;;  %vm102_vm5 = vcmp.eq.s32.totalorder %v893_v3, %v912_v18  ;;  %vm158_vm13 = vcmp.eq.s32.totalorder %v893_v3, %v914_v19  ;;  %v192_v14 = vadd.f32 %v773_v34, %v136_v33  ;;  %v203_v18 = vld [vmem:[%s1170_s2] sm:$0xff]  ;;  %v204_v19 = vld [vmem:[%s1170_s2 + $0x8] sm:$0xff] }
  0x21   :  { %401 = vmatpush.msrb.mxu0 %v191_v32  ;;  %v774_v36 = vsel %vm157_vm10, 1.0, %v840_v27  ;;  %v751_v37 = vsel %vm46_vm12, 1.0, %v840_v27  ;;  %v763_v15 = vsel %vm102_vm5, 1.0, %v840_v27  ;;  %v775_v39 = vsel %vm158_vm13, 1.0, %v840_v27  ;;  %v205_v27 = vld [vmem:[%s1170_s2 + $0x10] sm:$0xff] }
  0x22   :  { %v193_v38 = vadd.f32 %v774_v36, %v137_v35  ;;  %v138_v17 = vadd.f32 %v763_v15, %v751_v37  ;;  %430 = vmatpush.msrb.mxu1 %v192_v14  ;;  %vm360_vm6 = vcmask 171008   ;;  %v841_v4 = vmov 0  }
  0x23   :  { %838 = vset.pattern.permute.xlu0 %v841_v4  ;;  %839 = vset.pattern.permute.xlu1 %v841_v4  ;;  %vm646_vm14 = vcmask 130048   ;;  %vm739_vm15 = vcmask 1045508   ;;  %vm737_vm3 = vcmask 1041408  }
  0x24   :  { %788 = vmatmul.msk.f32.gmra.mxu0 %vm222_vm1, %v210_v13  ;;  %793 = vmatmul.msk.f32.gmra.mxu1 %vm222_vm1, %v210_v13  ;;  %v194_v3 = vadd.f32 %v775_v39, %v138_v17 }
  0x25   :  { %798 = vmatmul.msk.f32.gmra.mxu2 %vm222_vm1, %v210_v13  ;;  %803 = vmatmul.msk.f32.gmra.mxu3 %vm222_vm1, %v210_v13  ;;  %vm532_vm1 = vcmask 261120  }
  0x26   :  { %459 = vmatpush.msrb.mxu2 %v193_v38  ;;  %488 = vmatpush.msrb.mxu3 %v194_v3  ;;  %v518_v3 = vld [vmem:[%s1172_s4] sm:$0xff] }
  0x27   :  { %529 = vperm.xlu0 %838, %v521_v5  }
  0x2c   :  { %805 = vmatmul.msk.f32.vlgmr.msrb.gmra.mxu0 %vm360_vm6, %v203_v18  ;;  %810 = vmatmul.msk.f32.vlgmr.msrb.gmra.mxu1 %vm360_vm6, %v203_v18 }
  0x2d   :  { %815 = vmatmul.msk.f32.vlgmr.msrb.gmra.mxu2 %vm360_vm6, %v203_v18  ;;  %820 = vmatmul.msk.f32.vlgmr.msrb.gmra.mxu3 %vm360_vm6, %v203_v18 }
  0x2f   :  { %524 = vperm.xlu0 %838, %v520_v20  }
  0x34   :  { %806 = vmatmul.msk.f32.gmra.mxu0 %vm360_vm6, %v204_v19  ;;  %811 = vmatmul.msk.f32.gmra.mxu1 %vm360_vm6, %v204_v19 }
  0x35   :  { %816 = vmatmul.msk.f32.gmra.mxu2 %vm360_vm6, %v204_v19  ;;  %821 = vmatmul.msk.f32.gmra.mxu3 %vm360_vm6, %v204_v19 }
  0x3c   :  { %807 = vmatmul.msk.f32.gmra.mxu0 %vm360_vm6, %v205_v27  ;;  %812 = vmatmul.msk.f32.gmra.mxu1 %vm360_vm6, %v205_v27 }
  0x3d   :  { %817 = vmatmul.msk.f32.gmra.mxu2 %vm360_vm6, %v205_v27  ;;  %822 = vmatmul.msk.f32.gmra.mxu3 %vm360_vm6, %v205_v27 }
  0x44   :  { %808 = vmatmul.msk.f32.gmra.mxu0 %vm360_vm6, %v206_v40  ;;  %813 = vmatmul.msk.f32.gmra.mxu1 %vm360_vm6, %v206_v40 }
  0x45   :  { %818 = vmatmul.msk.f32.gmra.mxu2 %vm360_vm6, %v206_v40  ;;  %823 = vmatmul.msk.f32.gmra.mxu3 %vm360_vm6, %v206_v40 }
  0x89   :  { %v261_v41 = vpop.f32.mrf.mxu0  ;;  %v290_v42 = vpop.f32.mrf.mxu1 }
  0x90   :  { %v1127_v43 = vpop.f32.mrf.mxu2  ;;  %v1129_v44 = vpop.f32.mrf.mxu3 }
  0x91   :  { %v264_v45 = vpop.f32.mrf.mxu0  ;;  %v293_v46 = vpop.f32.mrf.mxu1 }
  0x98   :  { %v322_v47 = vpop.f32.mrf.mxu2  ;;  %v351_v48 = vpop.f32.mrf.mxu3 }
  0x99   :  { %v267_v49 = vpop.f32.mrf.mxu0  ;;  %v296_v50 = vpop.f32.mrf.mxu1 }
  0xa0   :  { %v325_v51 = vpop.f32.mrf.mxu2  ;;  %v354_v52 = vpop.f32.mrf.mxu3 }
  0xa1   :  { %v270_v53 = vpop.f32.mrf.mxu0  ;;  %v299_v54 = vpop.f32.mrf.mxu1 }
  0xa8   :  { %v328_v55 = vpop.f32.mrf.mxu2  ;;  %v357_v56 = vpop.f32.mrf.mxu3 }
  0xa9   :  { %v403_v57 = vpop.f32.mrf.mxu0  ;;  %v432_v58 = vpop.f32.mrf.mxu1 }
  0xaa   :  { %v404_v25 = vadd.f32 %v403_v57, %v261_v41  ;;  %v433_v26 = vadd.f32 %v432_v58, %v290_v42 }
  0xac   :  { %v502_v36 = vmax.f32 %v404_v25, 0.0  ;;  %v503_v37 = vmax.f32 %v433_v26, 0.0 }
  0xb0   :  { %v461_v59 = vpop.f32.mrf.mxu2  ;;  %v490_v60 = vpop.f32.mrf.mxu3 }
  0xb1   :  { %v406_v61 = vpop.f32.mrf.mxu0  ;;  %v435_v62 = vpop.f32.mrf.mxu1  ;;  %v462_v18 = vadd.f32 %v461_v59, %v1127_v43  ;;  %v491_v19 = vadd.f32 %v490_v60, %v1129_v44  ;;  %v519_v43 = vld [vmem:[%s1172_s4 + $0x8] sm:$0xff] }
  0xb2   :  { %v407_v21 = vadd.f32 %v406_v61, %v264_v45  ;;  %v436_v23 = vadd.f32 %v435_v62, %v293_v46  ;;  %v530_v44 = vpop.permute.xlu0 %529 }
  0xb3   :  { %v504_v45 = vmax.f32 %v462_v18, 0.0  ;;  %v505_v46 = vmax.f32 %v491_v19, 0.0 }
  0xb4   :  { %v506_v30 = vmax.f32 %v407_v21, 0.0  ;;  %v507_v31 = vmax.f32 %v436_v23, 0.0 }
  0xb8   :  { %v464_v63 = vpop.f32.mrf.mxu2  ;;  %v493_v0 = vpop.f32.mrf.mxu3 }
  0xb9   :  { %v409_v1 = vpop.f32.mrf.mxu0  ;;  %v438_v2 = vpop.f32.mrf.mxu1  ;;  %v465_v15 = vadd.f32 %v464_v63, %v322_v47  ;;  %v494_v38 = vadd.f32 %v493_v0, %v351_v48  ;;  %v640_v47 = vld [vmem:[%s1173_s7] sm:$0x3] }
  0xba   :  { %v410_v10 = vadd.f32 %v409_v1, %v267_v49  ;;  %v439_v11 = vadd.f32 %v438_v2, %v296_v50  ;;  %643 = vperm.xlu1 %839, %v640_v47   ;;  %v525_v50 = vpop.permute.xlu0 %524  ;;  %v639_v63 = vld [vmem:[%s1174_s6] sm:$0x3] }
  0xbb   :  { %v508_v41 = vmax.f32 %v465_v15, 0.0  ;;  %v509_v42 = vmax.f32 %v494_v38, 0.0 }
  0xbc   :  { %v510_v28 = vmax.f32 %v410_v10, 0.0  ;;  %v511_v29 = vmax.f32 %v439_v11, 0.0 }
  0xc0   :  { %v467_v6 = vpop.f32.mrf.mxu2  ;;  %v496_v7 = vpop.f32.mrf.mxu3 }
  0xc1   :  { %v412_v8 = vpop.f32.mrf.mxu0  ;;  %v441_v9 = vpop.f32.mrf.mxu1  ;;  %v468_v34 = vadd.f32 %v467_v6, %v325_v51  ;;  %v497_v35 = vadd.f32 %v496_v7, %v354_v52 }
  0xc2   :  { %v413_v12 = vadd.f32 %v412_v8, %v270_v53  ;;  %v442_v16 = vadd.f32 %v441_v9, %v299_v54 }
  0xc3   :  { %v512_v27 = vmax.f32 %v468_v34, 0.0  ;;  %v513_v40 = vmax.f32 %v497_v35, 0.0 }
  0xc4   :  { %v514_v24 = vmax.f32 %v413_v12, 0.0  ;;  %v515_v22 = vmax.f32 %v442_v16, 0.0 }
  0xc6   :  { %551 = vmatpush.msra.mxu0 %v514_v24  ;;  %574 = vmatpush.msra.mxu1 %v515_v22 }
  0xc8   :  { %v470_v32 = vpop.f32.mrf.mxu2  ;;  %v499_v33 = vpop.f32.mrf.mxu3  ;;  %552 = vmatpush.msra.mxu0 %v510_v28  ;;  %575 = vmatpush.msra.mxu1 %v511_v29 }
  0xc9   :  { %v471_v13 = vadd.f32 %v470_v32, %v328_v55  ;;  %v500_v14 = vadd.f32 %v499_v33, %v357_v56 }
  0xca   :  { %553 = vmatpush.msra.mxu0 %v506_v30  ;;  %576 = vmatpush.msra.mxu1 %v507_v31 }
  0xcb   :  { %v516_v17 = vmax.f32 %v471_v13, 0.0  ;;  %v517_v39 = vmax.f32 %v500_v14, 0.0 }
  0xcc   :  { %554 = vmatpush.msra.mxu0 %v502_v36  ;;  %577 = vmatpush.msra.mxu1 %v503_v37 }
  0xcd   :  { %597 = vmatpush.msra.mxu2 %v516_v17  ;;  %620 = vmatpush.msra.mxu3 %v517_v39 }
  0xce   :  { %826 = vmatmul.msk.f32.vlgmr.msra.gmra.mxu1 %vm532_vm1, %v518_v3  ;;  %824 = vmatmul.msk.f32.vlgmr.msra.gmra.mxu0 %vm532_vm1, %v518_v3 }
  0xcf   :  { %598 = vmatpush.msra.mxu2 %v512_v27  ;;  %621 = vmatpush.msra.mxu3 %v513_v40 }
  0xd1   :  { %599 = vmatpush.msra.mxu2 %v508_v41  ;;  %622 = vmatpush.msra.mxu3 %v509_v42 }
  0xd3   :  { %600 = vmatpush.msra.mxu2 %v504_v45  ;;  %623 = vmatpush.msra.mxu3 %v505_v46 }
  0xd4   :  { %828 = vmatmul.msk.f32.vlgmr.msra.gmra.mxu2 %vm532_vm1, %v518_v3  ;;  %830 = vmatmul.msk.f32.vlgmr.msra.gmra.mxu3 %vm532_vm1, %v518_v3 }
  0xd6   :  { %827 = vmatmul.msk.f32.gmra.mxu1 %vm532_vm1, %v519_v43  ;;  %825 = vmatmul.msk.f32.gmra.mxu0 %vm532_vm1, %v519_v43 }
  0xdc   :  { %829 = vmatmul.msk.f32.gmra.mxu2 %vm532_vm1, %v519_v43  ;;  %831 = vmatmul.msk.f32.gmra.mxu3 %vm532_vm1, %v519_v43 }
 0x12c   :  { %v644_v11 = vpop.permute.xlu1 %643 }
 0x14b   :  { %v579_v48 = vpop.f32.mrf.mxu1  ;;  %v556_v49 = vpop.f32.mrf.mxu0 }
 0x14c   :  { %v557_v51 = vadd.f32 %v556_v49, %v525_v50  ;;  %v580_v52 = vadd.f32 %v579_v48, %v525_v50 }
 0x14e   :  { %v632_v59 = vmax.f32 %v580_v52, 0.0  ;;  %v631_v60 = vmax.f32 %v557_v51, 0.0 }
 0x153   :  { %v582_v53 = vpop.f32.mrf.mxu1  ;;  %v559_v54 = vpop.f32.mrf.mxu0 }
 0x154   :  { %v583_v55 = vadd.f32 %v582_v53, %v530_v44  ;;  %v560_v56 = vadd.f32 %v559_v54, %v530_v44 }
 0x156   :  { %v636_v57 = vmax.f32 %v583_v55, 0.0  ;;  %v635_v58 = vmax.f32 %v560_v56, 0.0 }
 0x157   :  { %v602_v61 = vpop.f32.mrf.mxu2  ;;  %v625_v62 = vpop.f32.mrf.mxu3 }
 0x158   :  { %684 = vmatpush.msrb.mxu1 %v636_v57  ;;  %664 = vmatpush.msrb.mxu0 %v635_v58  ;;  %v603_v5 = vadd.f32 %v602_v61, %v525_v50  ;;  %v626_v6 = vadd.f32 %v625_v62, %v525_v50 }
 0x15a   :  { %685 = vmatpush.msrb.mxu1 %v632_v59  ;;  %665 = vmatpush.msrb.mxu0 %v631_v60  ;;  %v633_v9 = vmax.f32 %v603_v5, 0.0  ;;  %v634_v10 = vmax.f32 %v626_v6, 0.0 }
 0x15b   :  { %833 = vmatmul.msk.f32.vlgmr.msrb.gmra.mxu1 %vm646_vm14, %v639_v63  ;;  %832 = vmatmul.msk.f32.vlgmr.msrb.gmra.mxu0 %vm646_vm14, %v639_v63 }
 0x15f   :  { %v605_v0 = vpop.f32.mrf.mxu2  ;;  %v628_v1 = vpop.f32.mrf.mxu3 }
 0x160   :  { %v606_v2 = vadd.f32 %v605_v0, %v530_v44  ;;  %v629_v4 = vadd.f32 %v628_v1, %v530_v44 }
 0x162   :  { %v637_v7 = vmax.f32 %v606_v2, 0.0  ;;  %v638_v8 = vmax.f32 %v629_v4, 0.0 }
 0x164   :  { %704 = vmatpush.msrb.mxu2 %v637_v7  ;;  %724 = vmatpush.msrb.mxu3 %v638_v8 }
 0x166   :  { %705 = vmatpush.msrb.mxu2 %v633_v9  ;;  %725 = vmatpush.msrb.mxu3 %v634_v10 }
 0x167   :  { %834 = vmatmul.msk.f32.vlgmr.msrb.gmra.mxu2 %vm646_vm14, %v639_v63  ;;  %835 = vmatmul.msk.f32.vlgmr.msrb.gmra.mxu3 %vm646_vm14, %v639_v63 }
 0x1d8   :  { %v687_v12 = vpop.f32.mrf.mxu1  ;;  %v667_v20 = vpop.f32.mrf.mxu0 }
 0x1d9   :  { %v688_v16 = vadd.f32 %v687_v12, %v644_v11  ;;  %v668_v26 = vadd.f32 %v667_v20, %v644_v11 }
 0x1db   :  { %v734_v24 = vrot.slane %v688_v16, 6 }
 0x1dd   :  { %v738_v31 = vsel %vm737_vm3, %v668_v26, %v734_v24 }
 0x1ea   :  { %v707_v21 = vpop.f32.mrf.mxu2  ;;  %v727_v23 = vpop.f32.mrf.mxu3 }
 0x1eb   :  { %v708_v22 = vadd.f32 %v707_v21, %v644_v11  ;;  %v728_v25 = vadd.f32 %v727_v23, %v644_v11 }
 0x1ed   :  { %v735_v28 = vrot.slane %v708_v22, 4  ;;  %v736_v29 = vrot.slane %v728_v25, 2 }
 0x1ef   :  { %v740_v30 = vsel %vm739_vm15, %v735_v28, %v736_v29 }
 0x1f0   :  { %v741_v32 = vsel %vm235_vm0, %v738_v31, %v740_v30 }
 0x1f1   :  { %743 = vst [vmem:[%s1175_s8] sm:$0xff] %v741_v32 }

</bundles_post_ra>
